<compile_context>
chip_gen: v7x
topology: tpu7x:2x2x1
jax: 0.10.0
libtpu: 0.0.40
codegen_flags: <defaults>
</compile_context>

<pallas_src>
import jax
import jax.numpy as jnp
from jax import lax
from jax.experimental import pallas as pl
from jax.experimental.pallas import tpu as pltpu


def _round_up(n, m):
    return ((n + m - 1) // m) * m


def _pad_axis(a, axis, target):
    pad = target - a.shape[axis]
    if pad == 0:
        return a
    widths = [(0, 0)] * a.ndim
    widths[axis] = (0, pad)
    return jnp.pad(a, widths)


def _pick_divisor(total, target):
    t = max(1, min(total, target))
    while total % t:
        t -= 1
    return t


def _pick_lane_divisor(total, target):
    # `total` is a multiple of 128; return a multiple of 128 that divides it.
    t = max(128, min(total, (target // 128) * 128))
    while total % t:
        t -= 128
    return t


# ----------------------------------------------------------------------------
# Kernel 1: LSTM recurrence, streamed over S chunks, bulk-precomputed x gates
# ----------------------------------------------------------------------------
def lstm_kernel(x_ref, wih_t_ref, whh_t_ref, b_ref, hs_ref, gx_scr, h_scr, c_scr):
    # x_ref:   (tS*Bp, E)    bf16  time-major activations for this chunk
    # wih_t:   (E, 4Hp)      bf16
    # whh_t:   (Hp, 4Hp)     bf16
    # b_ref:   (1, 4Hp)      f32   (b_ih + b_hh, per-gate padded)
    # hs_ref:  (tS*Bp, Hp)   bf16  output hidden states for this chunk
    # gx_scr:  (tS*Bp, 4Hp)  f32   bulk x @ W_ih^T + b
    # h_scr/c_scr: (Bp, Hp)  f32   recurrent state carried across chunks
    rows, _ = gx_scr.shape
    Bp, Hp = h_scr.shape
    tS = rows // Bp

    @pl.when(pl.program_id(0) == 0)
    def _():
        h_scr[...] = jnp.zeros_like(h_scr)
        c_scr[...] = jnp.zeros_like(c_scr)

    # Hoisted input-to-hidden matmul: one full-size, MXU-efficient matmul per chunk
    # (bias folded in) instead of a tiny-M matmul on the sequential critical path.
    gx_scr[...] = (jnp.dot(x_ref[...], wih_t_ref[...],
                           preferred_element_type=jnp.float32) + b_ref[...])

    whh_t = whh_t_ref[...]                                   # (Hp, 4Hp) bf16

    def step(t, carry):
        h, c = carry                                         # f32, register-carried
        row = pl.multiple_of(t * Bp, Bp)                     # sublane-aligned
        gates = gx_scr[pl.ds(row, Bp), :] + jnp.dot(
            h.astype(jnp.bfloat16), whh_t, preferred_element_type=jnp.float32)

        # PyTorch gate ordering: i, f, g, o (each Hp slice is lane-aligned).
        i_g = jax.nn.sigmoid(gates[:, 0 * Hp:1 * Hp])
        f_g = jax.nn.sigmoid(gates[:, 1 * Hp:2 * Hp])
        g_g = jnp.tanh(gates[:, 2 * Hp:3 * Hp])
        o_g = jax.nn.sigmoid(gates[:, 3 * Hp:4 * Hp])

        c_new = f_g * c + i_g * g_g
        h_new = o_g * jnp.tanh(c_new)

        hs_ref[pl.ds(row, Bp), :] = h_new.astype(jnp.bfloat16)   # bf16 hs store
        return (h_new, c_new)

    # Unrolled so the hs store / bf16 cast of step t hide under step t+1's matmul.
    h_f, c_f = lax.fori_loop(0, tS, step, (h_scr[...], c_scr[...]), unroll=True)
    h_scr[...] = h_f
    c_scr[...] = c_f


# ----------------------------------------------------------------------------
# Kernel 2: output Linear, tiled over V ("parallel" -> both v7x TensorCores)
# ----------------------------------------------------------------------------
def fc_kernel(hs_ref, wfc_t_ref, bfc_ref, out_ref):
    out_ref[...] = (jnp.dot(hs_ref[...], wfc_t_ref[...],
                            preferred_element_type=jnp.float32) + bfc_ref[...])


def lstm_fc_pallas(x, w_ih, w_hh, b_ih, b_hh, w_fc, b_fc, *,
                   ts_chunk=32, tv_tile=512):
    """x: (B,S,E); w_ih: (4H,E); w_hh: (4H,H); b_*: (4H,); w_fc: (V,H); b_fc: (V,)"""
    B, S, E = x.shape
    H = w_hh.shape[1]
    V = w_fc.shape[0]

    Bp = _round_up(B, 16)       # full bf16 sublane packing; keeps per-step tile small
    Hp = _round_up(H, 128)      # lane-aligned gate slices
    Vp = _round_up(V, 128)      # lane-dense output tiles
    tS = _pick_divisor(S, ts_chunk)
    tV = _pick_lane_divisor(Vp, tv_tile)

    # --- glue: pad per-gate blocks, pre-transpose, cast MXU operands to bf16 ---
    wih = _pad_axis(w_ih.reshape(4, H, E), 1, Hp).reshape(4 * Hp, E)
    whh = _pad_axis(_pad_axis(w_hh.reshape(4, H, H), 1, Hp), 2, Hp).reshape(4 * Hp, Hp)
    b = _pad_axis((b_ih + b_hh).reshape(4, H), 1, Hp).reshape(4 * Hp)
    wfc = _pad_axis(_pad_axis(w_fc, 0, Vp), 1, Hp)           # (Vp, Hp)

    wih_t = wih.T.astype(jnp.bfloat16)                       # (E, 4Hp)
    whh_t = whh.T.astype(jnp.bfloat16)                       # (Hp, 4Hp)
    bias = b[None, :].astype(jnp.float32)                    # (1, 4Hp)
    wfc_t = wfc.T.astype(jnp.bfloat16)                       # (Hp, Vp)
    bfc = _pad_axis(b_fc, 0, Vp)[None, :].astype(jnp.float32)  # (1, Vp)

    # time-major, batch-padded, bf16 activations, flattened to (S*Bp, E)
    x_tm = jnp.transpose(x, (1, 0, 2))                       # (S, B, E)
    x_tm = _pad_axis(x_tm, 1, Bp).astype(jnp.bfloat16)       # (S, Bp, E)
    x_flat = x_tm.reshape(S * Bp, E)

    vmem_bytes = 32 * 1024 * 1024   # conservative: fits v7x 64 MiB, > v5e 16 MiB default

    # ---- LSTM recurrence, streamed over S chunks (sequential -> "arbitrary") ----
    hs = pl.pallas_call(
        lstm_kernel,
        out_shape=jax.ShapeDtypeStruct((S * Bp, Hp), jnp.bfloat16),
        grid=(S // tS,),
        in_specs=[
            pl.BlockSpec((tS * Bp, E), lambda s: (s, 0)),
            pl.BlockSpec((E, 4 * Hp), lambda s: (0, 0)),
            pl.BlockSpec((Hp, 4 * Hp), lambda s: (0, 0)),
            pl.BlockSpec((1, 4 * Hp), lambda s: (0, 0)),
        ],
        out_specs=pl.BlockSpec((tS * Bp, Hp), lambda s: (s, 0)),
        scratch_shapes=[
            pltpu.VMEM((tS * Bp, 4 * Hp), jnp.float32),       # gates_x for this chunk
            pltpu.VMEM((Bp, Hp), jnp.float32),                # h carry
            pltpu.VMEM((Bp, Hp), jnp.float32),                # c carry
        ],
        compiler_params=pltpu.CompilerParams(
            dimension_semantics=("arbitrary",),
            vmem_limit_bytes=vmem_bytes),
    )(x_flat, wih_t, whh_t, bias)

    # ---- FC projection, tiled over V ("parallel" -> megacore + pipelined tiles) ----
    out_flat = pl.pallas_call(
        fc_kernel,
        out_shape=jax.ShapeDtypeStruct((S * Bp, Vp), jnp.float32),
        grid=(Vp // tV,),
        in_specs=[
            pl.BlockSpec((S * Bp, Hp), lambda v: (0, 0)),     # hs resident across V tiles
            pl.BlockSpec((Hp, tV), lambda v: (0, v)),
            pl.BlockSpec((1, tV), lambda v: (0, v)),
        ],
        out_specs=pl.BlockSpec((S * Bp, tV), lambda v: (0, v)),
        compiler_params=pltpu.CompilerParams(
            dimension_semantics=("parallel",),
            vmem_limit_bytes=vmem_bytes),
    )(hs, wfc_t, bfc)

    out = out_flat.reshape(S, Bp, Vp)[:, :B, :V]              # (S, B, V)
    return jnp.transpose(out, (1, 0, 2))                      # (B, S, V)


# ----------------------------------------------------------------------------
# Model wrapper (mirrors ImageCaptioningModel.forward)
# ----------------------------------------------------------------------------
class ImageCaptioningModelPallas:
    def __init__(self, key, token_vocab, bert_hidden, hidden_size, vocab_size):
        ks = jax.random.split(key, 7)
        s = 0.1
        # TODO(synk): a full pretrained BERT encoder stack cannot be reproduced
        # in-script; `bert(input_ids)[0]` is stood in by a deterministic token
        # embedding lookup producing the (B, S, bert_hidden) last_hidden_state.
        self.bert_embed = s * jax.random.normal(ks[0], (token_vocab, bert_hidden), jnp.float32)
        # LSTM parameters (PyTorch layout)
        self.w_ih = s * jax.random.normal(ks[1], (4 * hidden_size, bert_hidden), jnp.float32)
        self.w_hh = s * jax.random.normal(ks[2], (4 * hidden_size, hidden_size), jnp.float32)
        self.b_ih = s * jax.random.normal(ks[3], (4 * hidden_size,), jnp.float32)
        self.b_hh = s * jax.random.normal(ks[4], (4 * hidden_size,), jnp.float32)
        # fc parameters (PyTorch layout)
        self.w_fc = s * jax.random.normal(ks[5], (vocab_size, hidden_size), jnp.float32)
        self.b_fc = s * jax.random.normal(ks[6], (vocab_size,), jnp.float32)
        self.hidden_size = hidden_size
        self.vocab_size = vocab_size

    def __call__(self, image_features, input_ids):
        del image_features  # unused — exactly as in the PyTorch forward
        bert_output = jnp.take(self.bert_embed, input_ids, axis=0)   # (B, S, E)
        # ts_chunk=4 exercises the multi-chunk streamed recurrence even at the toy
        # S=8; use 32-64 timesteps per chunk at realistic sequence lengths.
        return lstm_fc_pallas(bert_output, self.w_ih, self.w_hh,
                              self.b_ih, self.b_hh, self.w_fc, self.b_fc,
                              ts_chunk=4)


# ----------------------------------------------------------------------------
# Pure-JAX reference (for correctness check)
# ----------------------------------------------------------------------------
def reference_forward(model, image_features, input_ids):
    del image_features
    x = jnp.take(model.bert_embed, input_ids, axis=0)        # (B, S, E)
    B, S, E = x.shape
    H = model.hidden_size
    w_ih_t, w_hh_t = model.w_ih.T, model.w_hh.T
    bias = model.b_ih + model.b_hh

    def step(carry, x_t):
        h, c = carry
        gates = x_t @ w_ih_t + h @ w_hh_t + bias
        i_g = jax.nn.sigmoid(gates[:, 0 * H:1 * H])
        f_g = jax.nn.sigmoid(gates[:, 1 * H:2 * H])
        g_g = jnp.tanh(gates[:, 2 * H:3 * H])
        o_g = jax.nn.sigmoid(gates[:, 3 * H:4 * H])
        c = f_g * c + i_g * g_g
        h = o_g * jnp.tanh(c)
        return (h, c), h

    h0 = jnp.zeros((B, H), jnp.float32)
    c0 = jnp.zeros((B, H), jnp.float32)
    _, hs = lax.scan(step, (h0, c0), jnp.swapaxes(x, 0, 1))   # (S, B, H)
    rnn_out = jnp.swapaxes(hs, 0, 1)                          # (B, S, H)
    return rnn_out @ model.w_fc.T + model.b_fc                # (B, S, V)


if __name__ == "__main__":
    B, S = 2, 8
    TOKEN_VOCAB = 100     # input token id space (for the embedding stand-in)
    BERT_HIDDEN = 32      # bert_model.config.hidden_size
    HIDDEN = 32           # LSTM hidden_size
    VOCAB = 64            # output vocab_size

    key = jax.random.PRNGKey(0)
    k_model, k_img, k_ids = jax.random.split(key, 3)

    model = ImageCaptioningModelPallas(k_model, TOKEN_VOCAB, BERT_HIDDEN, HIDDEN, VOCAB)

    image_features = jax.random.normal(k_img, (B, 128), jnp.float32)   # unused by forward
    input_ids = jax.random.randint(k_ids, (B, S), 0, TOKEN_VOCAB, jnp.int32)

    out = model(image_features, input_ids)
    out = jax.block_until_ready(out)

    ref = reference_forward(model, image_features, input_ids)
    assert out.shape == (B, S, VOCAB), out.shape
    # bf16 MXU operands (and bf16 hs) -> widened tolerance vs f32 reference
    assert jnp.allclose(out, ref, atol=2e-2, rtol=2e-2), "mismatch vs pure-JAX reference"

    print("KERNEL_OK")
</pallas_src>

<mosaic_0001>
module attributes {stable_mosaic.version = 11 : i64} {
  func.func @lstm_kernel(%arg0: i32, %arg1: memref<64x32xbf16, #tpu.memory_space<vmem>>, %arg2: memref<32x512xbf16, #tpu.memory_space<vmem>>, %arg3: memref<128x512xbf16, #tpu.memory_space<vmem>>, %arg4: memref<1x512xf32, #tpu.memory_space<vmem>>, %arg5: memref<64x128xbf16, #tpu.memory_space<vmem>>, %arg6: memref<64x512xf32, #tpu.memory_space<vmem>>, %arg7: memref<16x128xf32, #tpu.memory_space<vmem>>, %arg8: memref<16x128xf32, #tpu.memory_space<vmem>>) attributes {dimension_semantics = [#tpu.dimension_semantics<arbitrary>], iteration_bounds = array<i64: 2>, scalar_prefetch = 0 : i64, scratch_operands = 3 : i64, tpu.core_type = #tpu.core_type<tc>, window_params = [{transform_indices = @transform_0, window_bounds = array<i64: 64, 32>}, {pipeline_mode = #tpu.pipeline_mode<synchronous>, transform_indices = @transform_1, window_bounds = array<i64: 32, 512>}, {pipeline_mode = #tpu.pipeline_mode<synchronous>, transform_indices = @transform_2, window_bounds = array<i64: 128, 512>}, {pipeline_mode = #tpu.pipeline_mode<synchronous>, transform_indices = @transform_3, window_bounds = array<i64: 1, 512>}, {transform_indices = @transform_4, window_bounds = array<i64: 64, 128>}]} {
    %c0_i32 = arith.constant 0 : i32
    %0 = arith.cmpi eq, %arg0, %c0_i32 : i32
    %1 = arith.extui %0 : i1 to i32
    %c0_i32_0 = arith.constant 0 : i32
    %2 = arith.cmpi ne, %1, %c0_i32_0 : i32
    scf.if %2 {
      %cst_46 = arith.constant 0.000000e+00 : f32
      %155 = vector.broadcast %cst_46 : f32 to vector<16x128xf32>
      %c0_47 = arith.constant 0 : index
      %c0_48 = arith.constant 0 : index
      %156 = vector.load %arg7[%c0_47, %c0_48] : memref<16x128xf32, #tpu.memory_space<vmem>>, vector<16x128xf32>
      tpu.vector_store %arg7[%c0_47, %c0_48], %155 {strides = array<i32>} : memref<16x128xf32, #tpu.memory_space<vmem>>, vector<16x128xf32>,
      %cst_49 = arith.constant 0.000000e+00 : f32
      %157 = vector.broadcast %cst_49 : f32 to vector<16x128xf32>
      %c0_50 = arith.constant 0 : index
      %c0_51 = arith.constant 0 : index
      %158 = vector.load %arg8[%c0_50, %c0_51] : memref<16x128xf32, #tpu.memory_space<vmem>>, vector<16x128xf32>
      tpu.vector_store %arg8[%c0_50, %c0_51], %157 {strides = array<i32>} : memref<16x128xf32, #tpu.memory_space<vmem>>, vector<16x128xf32>,
    } else {
    }
    %c0 = arith.constant 0 : index
    %c0_1 = arith.constant 0 : index
    %3 = vector.load %arg1[%c0, %c0_1] : memref<64x32xbf16, #tpu.memory_space<vmem>>, vector<64x32xbf16>
    %c0_2 = arith.constant 0 : index
    %c0_3 = arith.constant 0 : index
    %4 = vector.load %arg2[%c0_2, %c0_3] : memref<32x512xbf16, #tpu.memory_space<vmem>>, vector<32x512xbf16>
    %cst = arith.constant dense<0.000000e+00> : vector<64x512xf32>
    %5 = tpu.matmul %3, %4, %cst {dimension_numbers = #tpu.dot_dimension_numbers<[1], [0], [0], [1], [0, 0, 1, 1], [], []>} : vector<64x32xbf16>, vector<32x512xbf16>, vector<64x512xf32> -> vector<64x512xf32>
    %c0_4 = arith.constant 0 : index
    %c0_5 = arith.constant 0 : index
    %6 = vector.load %arg4[%c0_4, %c0_5] : memref<1x512xf32, #tpu.memory_space<vmem>>, vector<1x512xf32>
    %7 = vector.broadcast %6 : vector<1x512xf32> to vector<64x512xf32>
    %8 = arith.addf %5, %7 : vector<64x512xf32>
    %c0_6 = arith.constant 0 : index
    %c0_7 = arith.constant 0 : index
    %9 = vector.load %arg6[%c0_6, %c0_7] : memref<64x512xf32, #tpu.memory_space<vmem>>, vector<64x512xf32>
    tpu.vector_store %arg6[%c0_6, %c0_7], %8 {strides = array<i32>} : memref<64x512xf32, #tpu.memory_space<vmem>>, vector<64x512xf32>,
    %c0_8 = arith.constant 0 : index
    %c0_9 = arith.constant 0 : index
    %10 = vector.load %arg3[%c0_8, %c0_9] : memref<128x512xbf16, #tpu.memory_space<vmem>>, vector<128x512xbf16>
    %c0_10 = arith.constant 0 : index
    %c0_11 = arith.constant 0 : index
    %11 = vector.load %arg7[%c0_10, %c0_11] : memref<16x128xf32, #tpu.memory_space<vmem>>, vector<16x128xf32>
    %c0_12 = arith.constant 0 : index
    %c0_13 = arith.constant 0 : index
    %12 = vector.load %arg8[%c0_12, %c0_13] : memref<16x128xf32, #tpu.memory_space<vmem>>, vector<16x128xf32>
    %c0_i32_14 = arith.constant 0 : i32
    %c16_i32 = arith.constant 16 : i32
    %13 = arith.muli %c0_i32_14, %c16_i32 : i32
    %14 = tpu.assume_multiple %13, 16 : i32
    %15 = arith.index_cast %14 : i32 to index
    %c0_15 = arith.constant 0 : index
    %16 = vector.load %arg6[%15, %c0_15] : memref<64x512xf32, #tpu.memory_space<vmem>>, vector<16x512xf32>
    %17 = arith.truncf %11 : vector<16x128xf32> to vector<16x128xbf16>
    %cst_16 = arith.constant dense<0.000000e+00> : vector<16x512xf32>
    %18 = tpu.matmul %17, %10, %cst_16 {dimension_numbers = #tpu.dot_dimension_numbers<[1], [0], [0], [1], [0, 0, 1, 1], [], []>} : vector<16x128xbf16>, vector<128x512xbf16>, vector<16x512xf32> -> vector<16x512xf32>
    %19 = arith.addf %16, %18 : vector<16x512xf32>
    %20 = vector.extract_strided_slice %19 {offsets = [0, 0], sizes = [16, 128], strides = [1, 1]} : vector<16x512xf32> to vector<16x128xf32>
    %21 = arith.negf %20 : vector<16x128xf32>
    %22 = math.exp %21 : vector<16x128xf32>
    %cst_17 = arith.constant 1.000000e+00 : f32
    %23 = vector.broadcast %cst_17 : f32 to vector<16x128xf32>
    %24 = arith.addf %23, %22 : vector<16x128xf32>
    %25 = arith.divf %23, %24 : vector<16x128xf32>
    %26 = vector.extract_strided_slice %19 {offsets = [0, 128], sizes = [16, 128], strides = [1, 1]} : vector<16x512xf32> to vector<16x128xf32>
    %27 = arith.negf %26 : vector<16x128xf32>
    %28 = math.exp %27 : vector<16x128xf32>
    %cst_18 = arith.constant 1.000000e+00 : f32
    %29 = vector.broadcast %cst_18 : f32 to vector<16x128xf32>
    %30 = arith.addf %29, %28 : vector<16x128xf32>
    %31 = arith.divf %29, %30 : vector<16x128xf32>
    %32 = vector.extract_strided_slice %19 {offsets = [0, 256], sizes = [16, 128], strides = [1, 1]} : vector<16x512xf32> to vector<16x128xf32>
    %33 = math.tanh %32 : vector<16x128xf32>
    %34 = vector.extract_strided_slice %19 {offsets = [0, 384], sizes = [16, 128], strides = [1, 1]} : vector<16x512xf32> to vector<16x128xf32>
    %35 = arith.negf %34 : vector<16x128xf32>
    %36 = math.exp %35 : vector<16x128xf32>
    %cst_19 = arith.constant 1.000000e+00 : f32
    %37 = vector.broadcast %cst_19 : f32 to vector<16x128xf32>
    %38 = arith.addf %37, %36 : vector<16x128xf32>
    %39 = arith.divf %37, %38 : vector<16x128xf32>
    %40 = arith.mulf %31, %12 : vector<16x128xf32>
    %41 = arith.mulf %25, %33 : vector<16x128xf32>
    %42 = arith.addf %40, %41 : vector<16x128xf32>
    %43 = math.tanh %42 : vector<16x128xf32>
    %44 = arith.mulf %39, %43 : vector<16x128xf32>
    %45 = arith.truncf %44 : vector<16x128xf32> to vector<16x128xbf16>
    %46 = arith.index_cast %14 : i32 to index
    %c0_20 = arith.constant 0 : index
    %47 = vector.load %arg5[%46, %c0_20] : memref<64x128xbf16, #tpu.memory_space<vmem>>, vector<16x128xbf16>
    tpu.vector_store %arg5[%46, %c0_20], %45 {strides = array<i32>} : memref<64x128xbf16, #tpu.memory_space<vmem>>, vector<16x128xbf16>,
    %c1_i32 = arith.constant 1 : i32
    %c16_i32_21 = arith.constant 16 : i32
    %48 = arith.muli %c1_i32, %c16_i32_21 : i32
    %49 = tpu.assume_multiple %48, 16 : i32
    %50 = arith.index_cast %49 : i32 to index
    %c0_22 = arith.constant 0 : index
    %51 = vector.load %arg6[%50, %c0_22] : memref<64x512xf32, #tpu.memory_space<vmem>>, vector<16x512xf32>
    %52 = arith.truncf %44 : vector<16x128xf32> to vector<16x128xbf16>
    %cst_23 = arith.constant dense<0.000000e+00> : vector<16x512xf32>
    %53 = tpu.matmul %52, %10, %cst_23 {dimension_numbers = #tpu.dot_dimension_numbers<[1], [0], [0], [1], [0, 0, 1, 1], [], []>} : vector<16x128xbf16>, vector<128x512xbf16>, vector<16x512xf32> -> vector<16x512xf32>
    %54 = arith.addf %51, %53 : vector<16x512xf32>
    %55 = vector.extract_strided_slice %54 {offsets = [0, 0], sizes = [16, 128], strides = [1, 1]} : vector<16x512xf32> to vector<16x128xf32>
    %56 = arith.negf %55 : vector<16x128xf32>
    %57 = math.exp %56 : vector<16x128xf32>
    %cst_24 = arith.constant 1.000000e+00 : f32
    %58 = vector.broadcast %cst_24 : f32 to vector<16x128xf32>
    %59 = arith.addf %58, %57 : vector<16x128xf32>
    %60 = arith.divf %58, %59 : vector<16x128xf32>
    %61 = vector.extract_strided_slice %54 {offsets = [0, 128], sizes = [16, 128], strides = [1, 1]} : vector<16x512xf32> to vector<16x128xf32>
    %62 = arith.negf %61 : vector<16x128xf32>
    %63 = math.exp %62 : vector<16x128xf32>
    %cst_25 = arith.constant 1.000000e+00 : f32
    %64 = vector.broadcast %cst_25 : f32 to vector<16x128xf32>
    %65 = arith.addf %64, %63 : vector<16x128xf32>
    %66 = arith.divf %64, %65 : vector<16x128xf32>
    %67 = vector.extract_strided_slice %54 {offsets = [0, 256], sizes = [16, 128], strides = [1, 1]} : vector<16x512xf32> to vector<16x128xf32>
    %68 = math.tanh %67 : vector<16x128xf32>
    %69 = vector.extract_strided_slice %54 {offsets = [0, 384], sizes = [16, 128], strides = [1, 1]} : vector<16x512xf32> to vector<16x128xf32>
    %70 = arith.negf %69 : vector<16x128xf32>
    %71 = math.exp %70 : vector<16x128xf32>
    %cst_26 = arith.constant 1.000000e+00 : f32
    %72 = vector.broadcast %cst_26 : f32 to vector<16x128xf32>
    %73 = arith.addf %72, %71 : vector<16x128xf32>
    %74 = arith.divf %72, %73 : vector<16x128xf32>
    %75 = arith.mulf %66, %42 : vector<16x128xf32>
    %76 = arith.mulf %60, %68 : vector<16x128xf32>
    %77 = arith.addf %75, %76 : vector<16x128xf32>
    %78 = math.tanh %77 : vector<16x128xf32>
    %79 = arith.mulf %74, %78 : vector<16x128xf32>
    %80 = arith.truncf %79 : vector<16x128xf32> to vector<16x128xbf16>
    %81 = arith.index_cast %49 : i32 to index
    %c0_27 = arith.constant 0 : index
    %82 = vector.load %arg5[%81, %c0_27] : memref<64x128xbf16, #tpu.memory_space<vmem>>, vector<16x128xbf16>
    tpu.vector_store %arg5[%81, %c0_27], %80 {strides = array<i32>} : memref<64x128xbf16, #tpu.memory_space<vmem>>, vector<16x128xbf16>,
    %c2_i32 = arith.constant 2 : i32
    %c16_i32_28 = arith.constant 16 : i32
    %83 = arith.muli %c2_i32, %c16_i32_28 : i32
    %84 = tpu.assume_multiple %83, 16 : i32
    %85 = arith.index_cast %84 : i32 to index
    %c0_29 = arith.constant 0 : index
    %86 = vector.load %arg6[%85, %c0_29] : memref<64x512xf32, #tpu.memory_space<vmem>>, vector<16x512xf32>
    %87 = arith.truncf %79 : vector<16x128xf32> to vector<16x128xbf16>
    %cst_30 = arith.constant dense<0.000000e+00> : vector<16x512xf32>
    %88 = tpu.matmul %87, %10, %cst_30 {dimension_numbers = #tpu.dot_dimension_numbers<[1], [0], [0], [1], [0, 0, 1, 1], [], []>} : vector<16x128xbf16>, vector<128x512xbf16>, vector<16x512xf32> -> vector<16x512xf32>
    %89 = arith.addf %86, %88 : vector<16x512xf32>
    %90 = vector.extract_strided_slice %89 {offsets = [0, 0], sizes = [16, 128], strides = [1, 1]} : vector<16x512xf32> to vector<16x128xf32>
    %91 = arith.negf %90 : vector<16x128xf32>
    %92 = math.exp %91 : vector<16x128xf32>
    %cst_31 = arith.constant 1.000000e+00 : f32
    %93 = vector.broadcast %cst_31 : f32 to vector<16x128xf32>
    %94 = arith.addf %93, %92 : vector<16x128xf32>
    %95 = arith.divf %93, %94 : vector<16x128xf32>
    %96 = vector.extract_strided_slice %89 {offsets = [0, 128], sizes = [16, 128], strides = [1, 1]} : vector<16x512xf32> to vector<16x128xf32>
    %97 = arith.negf %96 : vector<16x128xf32>
    %98 = math.exp %97 : vector<16x128xf32>
    %cst_32 = arith.constant 1.000000e+00 : f32
    %99 = vector.broadcast %cst_32 : f32 to vector<16x128xf32>
    %100 = arith.addf %99, %98 : vector<16x128xf32>
    %101 = arith.divf %99, %100 : vector<16x128xf32>
    %102 = vector.extract_strided_slice %89 {offsets = [0, 256], sizes = [16, 128], strides = [1, 1]} : vector<16x512xf32> to vector<16x128xf32>
    %103 = math.tanh %102 : vector<16x128xf32>
    %104 = vector.extract_strided_slice %89 {offsets = [0, 384], sizes = [16, 128], strides = [1, 1]} : vector<16x512xf32> to vector<16x128xf32>
    %105 = arith.negf %104 : vector<16x128xf32>
    %106 = math.exp %105 : vector<16x128xf32>
    %cst_33 = arith.constant 1.000000e+00 : f32
    %107 = vector.broadcast %cst_33 : f32 to vector<16x128xf32>
    %108 = arith.addf %107, %106 : vector<16x128xf32>
    %109 = arith.divf %107, %108 : vector<16x128xf32>
    %110 = arith.mulf %101, %77 : vector<16x128xf32>
    %111 = arith.mulf %95, %103 : vector<16x128xf32>
    %112 = arith.addf %110, %111 : vector<16x128xf32>
    %113 = math.tanh %112 : vector<16x128xf32>
    %114 = arith.mulf %109, %113 : vector<16x128xf32>
    %115 = arith.truncf %114 : vector<16x128xf32> to vector<16x128xbf16>
    %116 = arith.index_cast %84 : i32 to index
    %c0_34 = arith.constant 0 : index
    %117 = vector.load %arg5[%116, %c0_34] : memref<64x128xbf16, #tpu.memory_space<vmem>>, vector<16x128xbf16>
    tpu.vector_store %arg5[%116, %c0_34], %115 {strides = array<i32>} : memref<64x128xbf16, #tpu.memory_space<vmem>>, vector<16x128xbf16>,
    %c3_i32 = arith.constant 3 : i32
    %c16_i32_35 = arith.constant 16 : i32
    %118 = arith.muli %c3_i32, %c16_i32_35 : i32
    %119 = tpu.assume_multiple %118, 16 : i32
    %120 = arith.index_cast %119 : i32 to index
    %c0_36 = arith.constant 0 : index
    %121 = vector.load %arg6[%120, %c0_36] : memref<64x512xf32, #tpu.memory_space<vmem>>, vector<16x512xf32>
    %122 = arith.truncf %114 : vector<16x128xf32> to vector<16x128xbf16>
    %cst_37 = arith.constant dense<0.000000e+00> : vector<16x512xf32>
    %123 = tpu.matmul %122, %10, %cst_37 {dimension_numbers = #tpu.dot_dimension_numbers<[1], [0], [0], [1], [0, 0, 1, 1], [], []>} : vector<16x128xbf16>, vector<128x512xbf16>, vector<16x512xf32> -> vector<16x512xf32>
    %124 = arith.addf %121, %123 : vector<16x512xf32>
    %125 = vector.extract_strided_slice %124 {offsets = [0, 0], sizes = [16, 128], strides = [1, 1]} : vector<16x512xf32> to vector<16x128xf32>
    %126 = arith.negf %125 : vector<16x128xf32>
    %127 = math.exp %126 : vector<16x128xf32>
    %cst_38 = arith.constant 1.000000e+00 : f32
    %128 = vector.broadcast %cst_38 : f32 to vector<16x128xf32>
    %129 = arith.addf %128, %127 : vector<16x128xf32>
    %130 = arith.divf %128, %129 : vector<16x128xf32>
    %131 = vector.extract_strided_slice %124 {offsets = [0, 128], sizes = [16, 128], strides = [1, 1]} : vector<16x512xf32> to vector<16x128xf32>
    %132 = arith.negf %131 : vector<16x128xf32>
    %133 = math.exp %132 : vector<16x128xf32>
    %cst_39 = arith.constant 1.000000e+00 : f32
    %134 = vector.broadcast %cst_39 : f32 to vector<16x128xf32>
    %135 = arith.addf %134, %133 : vector<16x128xf32>
    %136 = arith.divf %134, %135 : vector<16x128xf32>
    %137 = vector.extract_strided_slice %124 {offsets = [0, 256], sizes = [16, 128], strides = [1, 1]} : vector<16x512xf32> to vector<16x128xf32>
    %138 = math.tanh %137 : vector<16x128xf32>
    %139 = vector.extract_strided_slice %124 {offsets = [0, 384], sizes = [16, 128], strides = [1, 1]} : vector<16x512xf32> to vector<16x128xf32>
    %140 = arith.negf %139 : vector<16x128xf32>
    %141 = math.exp %140 : vector<16x128xf32>
    %cst_40 = arith.constant 1.000000e+00 : f32
    %142 = vector.broadcast %cst_40 : f32 to vector<16x128xf32>
    %143 = arith.addf %142, %141 : vector<16x128xf32>
    %144 = arith.divf %142, %143 : vector<16x128xf32>
    %145 = arith.mulf %136, %112 : vector<16x128xf32>
    %146 = arith.mulf %130, %138 : vector<16x128xf32>
    %147 = arith.addf %145, %146 : vector<16x128xf32>
    %148 = math.tanh %147 : vector<16x128xf32>
    %149 = arith.mulf %144, %148 : vector<16x128xf32>
    %150 = arith.truncf %149 : vector<16x128xf32> to vector<16x128xbf16>
    %151 = arith.index_cast %119 : i32 to index
    %c0_41 = arith.constant 0 : index
    %152 = vector.load %arg5[%151, %c0_41] : memref<64x128xbf16, #tpu.memory_space<vmem>>, vector<16x128xbf16>
    tpu.vector_store %arg5[%151, %c0_41], %150 {strides = array<i32>} : memref<64x128xbf16, #tpu.memory_space<vmem>>, vector<16x128xbf16>,
    %c4_i32 = arith.constant 4 : i32
    %c0_42 = arith.constant 0 : index
    %c0_43 = arith.constant 0 : index
    %153 = vector.load %arg7[%c0_42, %c0_43] : memref<16x128xf32, #tpu.memory_space<vmem>>, vector<16x128xf32>
    tpu.vector_store %arg7[%c0_42, %c0_43], %149 {strides = array<i32>} : memref<16x128xf32, #tpu.memory_space<vmem>>, vector<16x128xf32>,
    %c0_44 = arith.constant 0 : index
    %c0_45 = arith.constant 0 : index
    %154 = vector.load %arg8[%c0_44, %c0_45] : memref<16x128xf32, #tpu.memory_space<vmem>>, vector<16x128xf32>
    tpu.vector_store %arg8[%c0_44, %c0_45], %147 {strides = array<i32>} : memref<16x128xf32, #tpu.memory_space<vmem>>, vector<16x128xf32>,
    return
  }
  func.func @transform_0(%arg0: i32) -> (i32, i32) {
    %c0_i32 = arith.constant 0 : i32
    %c0_i32_0 = arith.constant 0 : i32
    return %arg0, %c0_i32 : i32, i32
  }
  func.func @transform_1(%arg0: i32) -> (i32, i32) {
    %c0_i32 = arith.constant 0 : i32
    %c0_i32_0 = arith.constant 0 : i32
    %c0_i32_1 = arith.constant 0 : i32
    return %c0_i32, %c0_i32_0 : i32, i32
  }
  func.func @transform_2(%arg0: i32) -> (i32, i32) {
    %c0_i32 = arith.constant 0 : i32
    %c0_i32_0 = arith.constant 0 : i32
    %c0_i32_1 = arith.constant 0 : i32
    return %c0_i32, %c0_i32_0 : i32, i32
  }
  func.func @transform_3(%arg0: i32) -> (i32, i32) {
    %c0_i32 = arith.constant 0 : i32
    %c0_i32_0 = arith.constant 0 : i32
    %c0_i32_1 = arith.constant 0 : i32
    return %c0_i32, %c0_i32_0 : i32, i32
  }
  func.func @transform_4(%arg0: i32) -> (i32, i32) {
    %c0_i32 = arith.constant 0 : i32
    %c0_i32_0 = arith.constant 0 : i32
    return %arg0, %c0_i32 : i32, i32
  }
}

</mosaic_0001>

<bundles_post_ra>
// kernel: tpu_custom_call.1
= control target key start
LH: loop header
LB: loop body
LE: loop exit
PB: predicated region body
PF: predicated region fallthrough
CT: control target
= control target key end

     0   :  { %9 = vsyncpa [#allocation6], 0  ;;  %s2501_s0 = inlined_call_operand.vmem [shape: bf16[128,32], index: 0, kind: input, shape index: {}]   ;;  %s2502_s1 = inlined_call_operand.vmem [shape: bf16[32,512], index: 1, kind: input, shape index: {}]   ;;  %s2503_s2 = inlined_call_operand.hbm [shape: bf16[128,512], index: 2, kind: input, shape index: {}]   ;;  %s2504_s3 = inlined_call_operand.vmem [shape: f32[1,512], index: 3, kind: input, shape index: {}]   ;;  %s2505_s4 = inlined_call_operand.hbm [shape: bf16[128,128], index: 4, kind: output, shape index: {}]  }
   0x1   :  { %10 = vsyncpa [#allocation7], 0 }
   0x2   :  { %12 = vsyncpa [#allocation7 + $0x1], 0  ;;  %s2037_s15 = smov 0   ;;  %s2039_s16 = smov 0  }
   0x3   :  { %s2041_s17 = smov 0   ;;  %s2043_s18 = smov 0  }
   0x4 LB: > { %s2058_s19 = sadd.s32 4294967295, %s2002_s18   ;;  %s1459_s20 = sadd.s32 4294967294, %s2002_s18   ;;  %s2002_s18 = sphi %s2043_s18, %s2522_s18   ;;  %s1998_s17 = sphi %s2041_s17, %s2521_s17   ;;  %s1994_s16 = sphi %s2039_s16, %s2520_s16   ;;  %s1990_s15 = sphi %s2037_s15, %s2519_s15  }
   0x5   : > { %s2062_s21 = sadd.s32 1, %s2002_s18   ;;  %s114_s22 = sadd.s32 1, %s1998_s17 }
   0x6   : > { %s111_s23 = ssub.s32 %s2002_s18, %s2062_s21  ;;  %p124_p0 = scmp.ne.s32.totalorder %s1998_s17, %s1994_s16 }
   0x7   : > { %p112_p1 = scmp.eq.s32.totalorder %s111_s23, 0  ;;  %p125_p2 = scmp.eq.s32.totalorder %s2058_s19, 1 }
   0x8   : > { %p130_p3 = scmp.ne.s32.totalorder %s1994_s16, %s1990_s15  ;;  %p131_p4 = scmp.eq.s32.totalorder %s1459_s20, 1 }
   0x9   : > { %s2073_s24 = scalar_select %p112_p1, %s1998_s17, %s114_s22  }
   0xa   : > { %p2075_p5 = por %p125_p2, %p124_p0  ;;  %p2079_p6 = por %p131_p4, %p130_p3 }
   0xb   : > { %p1460_p7 = scmp.ge.s32.totalorder %s2002_s18, 1  ;;  %p138_p8 = scmp.lt.s32.totalorder %s2002_s18, 3 }
   0xc   : > { %s2509_s25 = scalar_select %p2075_p5, 1, 0 }
   0xd   : > { %s2510_s26 = scalar_select %p2079_p6, 1, 0 }
   0xe   : > { %p2506_p10 = scmp.eq.s32.totalorder %s2058_s19, 0  ;;  %p2087_p11 = pnand %p1460_p7, %p138_p8 }
   0xf   : > { %s2004_s28 = smov [#allocation5]   ;;  %s1908_s7 = scalar_lea.hbm %s2503_s2, 4096 }
  0x10   : > { %s2511_s27 = scalar_select %p2087_p11, 1, 0 }
  0x11   : > { %s153_s29 = sshll.u32 %s2004_s28, 4  ;;  %p1666_p12 = pneg %p2087_p11  ;;  %s154_s29 = int_to_ptr.vmem [resolvable:$true] %s153_s29 }
  0x12   : > { %p1909_p0 = scmp.ne.s32.totalorder %s2503_s2, %s1908_s7  ;;  %p1915_p4 = scmp.lt.u32.totalorder %s1908_s7, %s2503_s2 }
  0x13   : > { %p2095_p13 = pnand %p2506_p10, %p1666_p12 }
  0x15   : > { %p1910_p1 = pneg %p2095_p13 }
  0x17   : > { %p1911_p2 = pnand %p1910_p1, %p1909_p0 }
  0x19   : > { %p1912_p3 = pneg %p1911_p2 }
  0x1b   : > { %p1917_p7 = pnand %p1915_p4, %p1912_p3 }
  0x1d   : > { %1920 = shalt.err (!%p1917_p7)
}
  0x1e   : > { %s1921_s12 = scalar_lea.vmem %s154_s29, 4096  ;;  %p1929_p10 = scmp.lt.s32.totalorder %s154_s29, %s154_s29 }
  0x1f   : > { %p1922_p8 = scmp.ne.s32.totalorder %s154_s29, %s1921_s12  ;;  %p1930_p6 = scmp.lt.s32.totalorder %s1921_s12, %s1921_s12 }
  0x21   : > { %p1924_p12 = pnand %p1922_p8, %p1910_p1  ;;  %p1931_p5 = por %p1930_p6, %p1929_p10 }
  0x23   : > { %p1925_p9 = pneg %p1924_p12 }
  0x25   : > { %p1932_p11 = pnand %p1931_p5, %p1925_p9 }
  0x27   : > { %1935 = shalt.err (!%p1932_p11)
}
  0x28   : > { %s2005_s13 = smov 256   ;;  %s2006_s14 = smov 16  }
  0x29   : > { %1669 = dma.hbm_to_vmem [thread:$0]  (!%p2095_p13), %s2503_s2, 4096, %s154_s29, [#allocation6], %s2005_s13, %s2005_s13, %s2006_s14  }
  0x2a   : > { %p2513_p0 = scmp.ne.s32.totalorder %s2511_s27, 0 }
  0x2b   : > { %p2514_p2 = scmp.eq.s32.totalorder (!%p2513_p0), %s2058_s19, 0 }
  0x2c   : > { %181 = sbr.rel (%p2513_p0) target bundleno = 1172 (0x494), region = 36 }
  0x33   : > { %1981 = dma.done.wait (%p2514_p2), [#allocation6], 4096   ;;  %p2515_p1 = pmov %p2514_p2 }
  0x34   : > { %s204_s23 = sand.u32 1, %s1994_s16   ;;  %s1466_s28 = sshll.u32 %s2058_s19, 3 }
  0x35   : > { %1983 = vsyncadd (%p2515_p1), [#allocation6], 4294963200  ;;  %s1465_s30 = sshll.u32 %s204_s23, 5  ;;  %p208_p5 = scmp.lt.s32.totalorder %s1466_s28, 15 }
  0x36   : > { %s2130_s7 = scalar_lea.vmem [#allocation8], %s1465_s30  ;;  %p2516_p6 = scmp.ne.s32.totalorder %s2058_s19, 0 }
  0x37   : > { %s2524_s28 = smov (!%p208_p5, %s1466_s28), 15  ;;  %v2007_v0 = vmov (!%p2516_p6), 0.0  }
  0x38   : > { %s1467_s5 = sshll.u32 %s2524_s28, 2  ;;  %218 = sbr.rel (%p2516_p6) target bundleno = 63 (0x3f), region = 44  ;;  %219 = vst [vmem:[#allocation3] sm:$0xff] (!%p2516_p6), %v2007_v0  ;;  %220 = vst [vmem:[#allocation3 + $0x8] sm:$0xff] (!%p2516_p6), %v2007_v0 }
  0x39   : > { %s2128_s27 = scalar_lea.vmem %s2501_s0, %s1467_s5  ;;  %221 = vst [vmem:[#allocation4] sm:$0xff] (!%p2516_p6), %v2007_v0  ;;  %222 = vst [vmem:[#allocation4 + $0x8] sm:$0xff] (!%p2516_p6), %v2007_v0 }
  0x3f PF: > { %v1716_v1 = vld [vmem:[%s2502_s1 + $0x4] ss:$16 sps:$4 sm:$0xff]   ;;  %v1718_v2 = vld [vmem:[%s2502_s1 + $0xc] ss:$16 sps:$4 sm:$0xff]   ;;  %v2008_v3 = vmov 0   ;;  %vm321_vm0 = vcmask 261120   ;;  %v241_v49 = vlaneseq }
  0x40   : > { %366 = vmatprep.mubr.bf16.mxu0 %v2008_v3  ;;  %439 = vmatprep.mubr.bf16.mxu1 %v2008_v3  ;;  %v1720_v4 = vld [vmem:[%s2502_s1] ss:$16 sps:$4 sm:$0xff]   ;;  %v1721_v5 = vld [vmem:[%s2502_s1 + $0x8] ss:$16 sps:$4 sm:$0xff]   ;;  %v1722_v6 = vld [vmem:[%s2502_s1 + $0x24] ss:$16 sps:$4 sm:$0xff]  }
  0x41   : > { %334 = vmatprep.subr.bf16.mxu0 %v1716_v1  ;;  %407 = vmatprep.subr.bf16.mxu1 %v1718_v2  ;;  %v1724_v7 = vld [vmem:[%s2502_s1 + $0x2c] ss:$16 sps:$4 sm:$0xff]   ;;  %v1726_v8 = vld [vmem:[%s2502_s1 + $0x20] ss:$16 sps:$4 sm:$0xff]   ;;  %v1727_v9 = vld [vmem:[%s2502_s1 + $0x28] ss:$16 sps:$4 sm:$0xff]  }
  0x42   : > { %335 = vmatpush1.bf16.msra.mxu0 %v1720_v4  ;;  %408 = vmatpush1.bf16.msra.mxu1 %v1721_v5  ;;  %v1728_v10 = vld [vmem:[%s2128_s27] sm:$0xff]   ;;  %v2163_v12 = vld [vmem:[#allocation5 + $0xc] ss:$16 sps:$4 sm:$0xff]   ;;  %v2167_v14 = vld [vmem:[#allocation5 + $0x8] ss:$16 sps:$4 sm:$0xff]   ;;  %v242_v50 = vshrl.u32 %v241_v49, 7 }
  0x43   : > { %336 = vmatprep.subr.bf16.mxu0 %v1722_v6  ;;  %409 = vmatprep.subr.bf16.mxu1 %v1724_v7  ;;  %v2161_v11 = vld [vmem:[#allocation5 + $0x4] ss:$16 sps:$4 sm:$0xff]   ;;  %v2165_v13 = vld [vmem:[#allocation5] ss:$16 sps:$4 sm:$0xff]   ;;  %v2173_v16 = vld [vmem:[#allocation5 + $0x2c] ss:$16 sps:$4 sm:$0xff]  }
  0x44   : > { %v2170_v15 = vld [vmem:[#allocation5 + $0x24] ss:$16 sps:$4 sm:$0xff]   ;;  %v2177_v17 = vld [vmem:[#allocation5 + $0x20] ss:$16 sps:$4 sm:$0xff]   ;;  %v2181_v18 = vld [vmem:[#allocation5 + $0x28] ss:$16 sps:$4 sm:$0xff]  }
  0x45   : > { %v2185_v19 = vld [vmem:[#allocation5 + $0x44] ss:$16 sps:$4 sm:$0xff]   ;;  %v1741_v20 = vld [vmem:[%s2128_s27 + $0x8] sm:$0xff]   ;;  %v2192_v22 = vld [vmem:[#allocation5 + $0x40] ss:$16 sps:$4 sm:$0xff]   ;;  %v243_v51 = vsub.s32 0, %v242_v50 }
  0x46   : > { %337 = vmatpush1.bf16.msra.mxu0 %v1726_v8  ;;  %410 = vmatpush1.bf16.msra.mxu1 %v1727_v9  ;;  %v2190_v21 = vld [vmem:[#allocation5 + $0x4c] ss:$16 sps:$4 sm:$0xff]   ;;  %v2196_v23 = vld [vmem:[#allocation5 + $0x48] ss:$16 sps:$4 sm:$0xff]   ;;  %v2200_v24 = vld [vmem:[#allocation5 + $0x64] ss:$16 sps:$4 sm:$0xff]  }
  0x47   : > { %720 = vmatprep.subr.bf16.mxu0 %v2161_v11  ;;  %763 = vmatprep.subr.bf16.mxu1 %v2163_v12  ;;  %v2202_v25 = vld [vmem:[#allocation5 + $0x6c] ss:$16 sps:$4 sm:$0xff]   ;;  %v2206_v26 = vld [vmem:[#allocation5 + $0x60] ss:$16 sps:$4 sm:$0xff]   ;;  %v2210_v27 = vld [vmem:[#allocation5 + $0x68] ss:$16 sps:$4 sm:$0xff]  }
  0x48   : > { %v2214_v28 = vld [vmem:[#allocation5 + $0x84] ss:$16 sps:$4 sm:$0xff]   ;;  %v2216_v29 = vld [vmem:[#allocation5 + $0x8c] ss:$16 sps:$4 sm:$0xff]   ;;  %v2221_v31 = vld [vmem:[#allocation5 + $0x80] ss:$16 sps:$4 sm:$0xff]  }
  0x49   : > { %1481 = vmatmul.mubr.msk.bf16.vlgmr.msra.gmra.mrb[0].mxu0 %vm321_vm0, %v1728_v10  ;;  %1485 = vmatmul.mubr.msk.bf16.vlgmr.msra.gmra.mrb[0].mxu1 %vm321_vm0, %v1728_v10  ;;  %v1754_v30 = vld [vmem:[%s2128_s27 + $0x10] sm:$0xff]   ;;  %v2223_v32 = vld [vmem:[#allocation5 + $0x88] ss:$16 sps:$4 sm:$0xff]   ;;  %v2231_v34 = vld [vmem:[#allocation5 + $0xac] ss:$16 sps:$4 sm:$0xff]   ;;  %v247_v53 = vsub.s32 1, %v242_v50 }
  0x4a   : > { %721 = vmatpush1.bf16.msra.mxu0 %v2165_v13  ;;  %764 = vmatpush1.bf16.msra.mxu1 %v2167_v14  ;;  %v2227_v33 = vld [vmem:[#allocation5 + $0xa4] ss:$16 sps:$4 sm:$0xff]   ;;  %v2235_v35 = vld [vmem:[#allocation5 + $0xa0] ss:$16 sps:$4 sm:$0xff]   ;;  %v2237_v36 = vld [vmem:[#allocation5 + $0xa8] ss:$16 sps:$4 sm:$0xff]  }
  0x4b   : > { %722 = vmatprep.subr.bf16.mxu0 %v2170_v15  ;;  %765 = vmatprep.subr.bf16.mxu1 %v2173_v16  ;;  %v2241_v37 = vld [vmem:[#allocation5 + $0xc4] ss:$16 sps:$4 sm:$0xff]   ;;  %v2245_v38 = vld [vmem:[#allocation5 + $0xcc] ss:$16 sps:$4 sm:$0xff]   ;;  %v2252_v40 = vld [vmem:[#allocation5 + $0xc0] ss:$16 sps:$4 sm:$0xff]  }
  0x4c   : > { %376 = vmatprep.mubr.bf16.mxu0 %v2008_v3  ;;  %449 = vmatprep.mubr.bf16.mxu1 %v2008_v3  ;;  %v1767_v39 = vld [vmem:[%s2128_s27 + $0x18] sm:$0xff]   ;;  %v2258_v42 = vld [vmem:[#allocation5 + $0xe4] ss:$16 sps:$4 sm:$0xff]   ;;  %v2264_v44 = vld [vmem:[#allocation5 + $0xe0] ss:$16 sps:$4 sm:$0xff]   ;;  %v255_v58 = vsub.s32 3, %v242_v50 }
  0x4d   : > { %v2254_v41 = vld [vmem:[#allocation5 + $0xc8] ss:$16 sps:$4 sm:$0xff]   ;;  %v2260_v43 = vld [vmem:[#allocation5 + $0xec] ss:$16 sps:$4 sm:$0xff]   ;;  %v544_v46 = vld [vmem:[#allocation3] sm:$0xff]  ;;  %v251_v2 = vsub.s32 2, %v242_v50 }
  0x4e   : > { %723 = vmatpush1.bf16.msra.mxu0 %v2177_v17  ;;  %766 = vmatpush1.bf16.msra.mxu1 %v2181_v18  ;;  %v2268_v45 = vld [vmem:[#allocation5 + $0xe8] ss:$16 sps:$4 sm:$0xff]   ;;  %v239_v52 = vld [vmem:[%s2504_s3] sm:$0xf]  ;;  %s1572_s11 = sshll.u32 %s2058_s19, 9  ;;  %s1382_s12 = sshll.u32 %s2130_s7, 4  ;;  %s2455_s12 = int_to_ptr.vmem [resolvable:$true] %s1382_s12 }
  0x4f   : > { %724 = vmatprep.subr.bf16.mxu0 %v2185_v19  ;;  %767 = vmatprep.subr.bf16.mxu1 %v2190_v21  ;;  %v545_v47 = vld [vmem:[#allocation3 + $0x8] sm:$0xff]  ;;  %v2315_v54 = vrot.slane %v239_v52, %v243_v51  ;;  %v2317_v55 = vrot.slane %v239_v52, %v247_v53  ;;  %v2322_v8 = vrot.slane %v239_v52, %v255_v58  ;;  %s2453_s20 = scalar_lea.hbm %s2505_s4, %s1572_s11  ;;  %s2460_s22 = scalar_lea.sflag [#allocation7], %s204_s23 }
  0x50   : > { %v559_v48 = vpack.c.bf16 %v545_v47, %v544_v46  ;;  %s1936_s19 = scalar_lea.vmem %s2455_s12, 512  ;;  %p2517_p10 = scmp.ne.s32.totalorder %s2509_s25, 0 }
  0x51   : > { %1482 = vmatmul.mubr.msk.bf16.gmra.mrb[4].mxu0 %vm321_vm0, %v1741_v20  ;;  %1486 = vmatmul.mubr.msk.bf16.gmra.mrb[4].mxu1 %vm321_vm0, %v1741_v20  ;;  %p1937_p9 = scmp.ne.s32.totalorder %s2455_s12, %s1936_s19  ;;  %s2009_s28 = smov [#allocation8]  }
  0x52   : > { %725 = vmatpush1.bf16.msra.mxu0 %v2192_v22  ;;  %768 = vmatpush1.bf16.msra.mxu1 %v2196_v23  ;;  %s1940_s30 = sshll.u32 %s2009_s28, 4  ;;  %s1941_s30 = int_to_ptr.vmem [resolvable:$false] %s1940_s30 }
  0x53   : > { %726 = vmatprep.subr.bf16.mxu0 %v2200_v24  ;;  %769 = vmatprep.subr.bf16.mxu1 %v2202_v25  ;;  %p1938_p11 = pnand %p1937_p9, %p2517_p10  ;;  %s1942_s5 = scalar_lea.vmem %s1941_s30, 1024 }
  0x54   : > { %386 = vmatprep.mubr.bf16.mxu0 %v2008_v3  ;;  %459 = vmatprep.mubr.bf16.mxu1 %v2008_v3  ;;  %p1943_p3 = scmp.lt.s32.totalorder %s2455_s12, %s1941_s30  ;;  %p1944_p4 = scmp.lt.s32.totalorder %s1942_s5, %s1936_s19 }
  0x55   : > { %p1939_p13 = pneg %p1938_p11 }
  0x56   : > { %727 = vmatpush1.bf16.msra.mxu0 %v2206_v26  ;;  %770 = vmatpush1.bf16.msra.mxu1 %v2210_v27  ;;  %p1945_p7 = por %p1944_p4, %p1943_p3 }
  0x57   : > { %728 = vmatprep.subr.bf16.mxu0 %v2214_v28  ;;  %771 = vmatprep.subr.bf16.mxu1 %v2216_v29 }
  0x58   : > { %p1946_p8 = pnand %p1945_p7, %p1939_p13 }
  0x59   : > { %1483 = vmatmul.mubr.msk.bf16.gmra.mrb[8].mxu0 %vm321_vm0, %v1754_v30  ;;  %1487 = vmatmul.mubr.msk.bf16.gmra.mrb[8].mxu1 %vm321_vm0, %v1754_v30  ;;  %v2325_v30 = vrot.slane %v239_v52, %v251_v2 }
  0x5a   : > { %729 = vmatpush1.bf16.msra.mxu0 %v2221_v31  ;;  %772 = vmatpush1.bf16.msra.mxu1 %v2223_v32 }
  0x5b   : > { %730 = vmatprep.subr.bf16.mxu0 %v2227_v33  ;;  %773 = vmatprep.subr.bf16.mxu1 %v2231_v34 }
  0x5c   : > { %396 = vmatprep.mubr.bf16.mxu0 %v2008_v3  ;;  %469 = vmatprep.mubr.bf16.mxu1 %v2008_v3 }
  0x5e   : > { %731 = vmatpush1.bf16.msra.mxu0 %v2235_v35  ;;  %774 = vmatpush1.bf16.msra.mxu1 %v2237_v36 }
  0x5f   : > { %732 = vmatprep.subr.bf16.mxu0 %v2241_v37  ;;  %775 = vmatprep.subr.bf16.mxu1 %v2245_v38 }
  0x61   : > { %1484 = vmatmul.mubr.msk.bf16.gmra.mrb[12].mxu0 %vm321_vm0, %v1767_v39  ;;  %1488 = vmatmul.mubr.msk.bf16.gmra.mrb[12].mxu1 %vm321_vm0, %v1767_v39 }
  0x62   : > { %733 = vmatpush1.bf16.msra.mxu0 %v2252_v40  ;;  %776 = vmatpush1.bf16.msra.mxu1 %v2254_v41 }
  0x63   : > { %734 = vmatprep.subr.bf16.mxu0 %v2258_v42  ;;  %777 = vmatprep.subr.bf16.mxu1 %v2260_v43 }
  0x64   : > { %752 = vmatprep.mubr.bf16.mxu0 %v2008_v3  ;;  %795 = vmatprep.mubr.bf16.mxu1 %v2008_v3 }
  0x66   : > { %735 = vmatpush1.bf16.msra.mxu0 %v2264_v44  ;;  %778 = vmatpush1.bf16.msra.mxu1 %v2268_v45 }
  0x67   : > { %883 = vmatprep.subr.bf16.mxu0 %v2161_v11  ;;  %926 = vmatprep.subr.bf16.mxu1 %v2163_v12 }
  0x69   : > { %753 = vmatmul.mubr.bf16.vlgmr.msra.gmra.mrb[0].mxu0 %v559_v48  ;;  %796 = vmatmul.mubr.bf16.vlgmr.msra.gmra.mrb[0].mxu1 %v559_v48 }
  0x6a   : > { %884 = vmatpush1.bf16.msra.mxu0 %v2165_v13  ;;  %927 = vmatpush1.bf16.msra.mxu1 %v2167_v14 }
  0x6b   : > { %885 = vmatprep.subr.bf16.mxu0 %v2170_v15  ;;  %928 = vmatprep.subr.bf16.mxu1 %v2173_v16 }
  0x6c   : > { %915 = vmatprep.mubr.bf16.mxu0 %v2008_v3  ;;  %958 = vmatprep.mubr.bf16.mxu1 %v2008_v3 }
  0x6e   : > { %886 = vmatpush1.bf16.msra.mxu0 %v2177_v17  ;;  %929 = vmatpush1.bf16.msra.mxu1 %v2181_v18 }
  0x6f   : > { %887 = vmatprep.subr.bf16.mxu0 %v2185_v19  ;;  %930 = vmatprep.subr.bf16.mxu1 %v2190_v21 }
  0x72   : > { %888 = vmatpush1.bf16.msra.mxu0 %v2192_v22  ;;  %931 = vmatpush1.bf16.msra.mxu1 %v2196_v23 }
  0x73   : > { %889 = vmatprep.subr.bf16.mxu0 %v2200_v24  ;;  %932 = vmatprep.subr.bf16.mxu1 %v2202_v25 }
  0x76   : > { %890 = vmatpush1.bf16.msra.mxu0 %v2206_v26  ;;  %933 = vmatpush1.bf16.msra.mxu1 %v2210_v27 }
  0x77   : > { %891 = vmatprep.subr.bf16.mxu0 %v2214_v28  ;;  %934 = vmatprep.subr.bf16.mxu1 %v2216_v29 }
  0x7a   : > { %892 = vmatpush1.bf16.msra.mxu0 %v2221_v31  ;;  %935 = vmatpush1.bf16.msra.mxu1 %v2223_v32 }
  0x7b   : > { %893 = vmatprep.subr.bf16.mxu0 %v2227_v33  ;;  %936 = vmatprep.subr.bf16.mxu1 %v2231_v34 }
  0x7e   : > { %894 = vmatpush1.bf16.msra.mxu0 %v2235_v35  ;;  %937 = vmatpush1.bf16.msra.mxu1 %v2237_v36 }
  0x7f   : > { %895 = vmatprep.subr.bf16.mxu0 %v2241_v37  ;;  %938 = vmatprep.subr.bf16.mxu1 %v2245_v38 }
  0x82   : > { %896 = vmatpush1.bf16.msra.mxu0 %v2252_v40  ;;  %939 = vmatpush1.bf16.msra.mxu1 %v2254_v41 }
  0x83   : > { %897 = vmatprep.subr.bf16.mxu0 %v2258_v42  ;;  %940 = vmatprep.subr.bf16.mxu1 %v2260_v43 }
  0x86   : > { %898 = vmatpush1.bf16.msra.mxu0 %v2264_v44  ;;  %941 = vmatpush1.bf16.msra.mxu1 %v2268_v45 }
  0x87   : > { %1047 = vmatprep.subr.bf16.mxu0 %v2161_v11  ;;  %1090 = vmatprep.subr.bf16.mxu1 %v2163_v12 }
 0x13c   : > { %v754_v56 = vpop.f32.mrb[0].mxu0  ;;  %v797_v57 = vpop.f32.mrb[0].mxu1 }
 0x13d   : > { %v1596_v59 = vadd.f32 %v754_v56, %v2315_v54  ;;  %v756_v60 = vpop.f32.mrb[1].mxu0  ;;  %v799_v61 = vpop.f32.mrb[1].mxu1  ;;  %v1612_v46 = vadd.f32 %v797_v57, %v2325_v30 }
 0x13e   : > { %v1597_v62 = vadd.f32 %v756_v60, %v2317_v55  ;;  %v758_v63 = vpop.f32.mrb[2].mxu0  ;;  %v801_v0 = vpop.f32.mrb[2].mxu1  ;;  %v1613_v39 = vadd.f32 %v799_v61, %v2322_v8 }
 0x13f   : > { %v1521_v1 = vmul.f32 -1.442695, %v1596_v59  ;;  %v1598_v4 = vadd.f32 %v758_v63, %v2315_v54  ;;  %v760_v5 = vpop.f32.mrb[3].mxu0  ;;  %v803_v6 = vpop.f32.mrb[3].mxu1  ;;  %v1614_v49 = vadd.f32 %v801_v0, %v2325_v30  ;;  %v546_v0 = vld [vmem:[#allocation4] sm:$0xff] }
 0x140   : > { %v1523_v7 = vmul.f32 -1.442695, %v1597_v62  ;;  %v1599_v9 = vadd.f32 %v760_v5, %v2317_v55  ;;  %v1525_v47 = vmul.f32 -1.442695, %v1613_v39  ;;  %v1615_v48 = vadd.f32 %v803_v6, %v2322_v8 }
 0x141   : > { %1780 = vpow2.f32 %v1521_v1  ;;  %v1522_v10 = vmul.f32 -1.442695, %v1598_v4 }
 0x142   : > { %1782 = vpow2.f32 %v1523_v7  ;;  %v1524_v20 = vmul.f32 -1.442695, %v1599_v9  ;;  %v1526_v56 = vmul.f32 -1.442695, %v1615_v48 }
 0x143   : > { %1784 = vpow2.f32 %v1522_v10  ;;  %v547_v10 = vld [vmem:[#allocation4 + $0x8] sm:$0xff] }
 0x144   : > { %1786 = vpow2.f32 %v1524_v20 }
 0x145   : > { %1788 = vtanh.f32 %v1612_v46 }
 0x146   : > { %1790 = vpow2.f32 %v1525_v47 }
 0x147   : > { %1792 = vtanh.f32 %v1614_v49 }
 0x14b   : > { %v1781_v50 = vpop.eup %1780 }
 0x14c   : > { %v1783_v51 = vpop.eup %1782  ;;  %v820_v53 = vadd.f32 1.0, %v1781_v50 }
 0x14d   : > { %v832_v58 = vadd.f32 1.0, %v1783_v51  ;;  %v1785_v52 = vpop.eup %1784 }
 0x14e   : > { %1794 = vrcp.f32 %v820_v53  ;;  %v821_v59 = vadd.f32 1.0, %v1785_v52  ;;  %v1787_v60 = vpop.eup %1786 }
 0x14f   : > { %1796 = vrcp.f32 %v832_v58  ;;  %v833_v57 = vadd.f32 1.0, %v1787_v60  ;;  %v1789_v61 = vpop.eup %1788 }
 0x150   : > { %1798 = vpow2.f32 %v1526_v56  ;;  %v1791_v62 = vpop.eup %1790 }
 0x151   : > { %1800 = vrcp.f32 %v821_v59  ;;  %v1793_v63 = vpop.eup %1792  ;;  %v846_v9 = vadd.f32 1.0, %v1791_v62 }
 0x152   : > { %1802 = vrcp.f32 %v833_v57 }
 0x153   : > { %1804 = vrcp.f32 %v846_v9 }
 0x158   : > { %v1795_v1 = vpop.eup %1794 }
 0x159   : > { %v1797_v2 = vpop.eup %1796  ;;  %v854_v4 = vmul.f32 %v1795_v1, %v1789_v61 }
 0x15a   : > { %v1799_v5 = vpop.eup %1798  ;;  %v852_v6 = vmul.f32 %v1797_v2, %v546_v0 }
 0x15b   : > { %v1801_v7 = vpop.eup %1800  ;;  %v847_v47 = vadd.f32 1.0, %v1799_v5 }
 0x15c   : > { %v2331_v20 = vadd.f32 %v854_v4, %v852_v6  ;;  %v855_v39 = vmul.f32 %v1801_v7, %v1793_v63  ;;  %v1803_v46 = vpop.eup %1802 }
 0x15d   : > { %v853_v48 = vmul.f32 %v1803_v46, %v547_v10  ;;  %v1805_v50 = vpop.eup %1804 }
 0x15e   : > { %1806 = vtanh.f32 %v2331_v20 }
 0x15f   : > { %v2334_v49 = vadd.f32 %v855_v39, %v853_v48  ;;  %1808 = vrcp.f32 %v847_v47 }
 0x161   : > { %1810 = vtanh.f32 %v2334_v49 }
 0x168   : > { %v1807_v51 = vpop.eup %1806 }
 0x169   : > { %v1809_v53 = vpop.eup %1808  ;;  %v860_v58 = vmul.f32 %v1807_v51, %v1805_v50 }
 0x16b   : > { %v1811_v56 = vpop.eup %1810 }
 0x16c   : > { %v861_v52 = vmul.f32 %v1811_v56, %v1809_v53 }
 0x16e   : > { %v862_v59 = vpack.c.bf16 %v861_v52, %v860_v58 }
 0x170   : > { %1577 = vst [vmem:[%s2130_s7] sm:$0xff] %v862_v59   ;;  %916 = vmatmul.mubr.bf16.vlgmr.msra.gmra.mrb[4].mxu0 %v862_v59  ;;  %959 = vmatmul.mubr.bf16.vlgmr.msra.gmra.mrb[4].mxu1 %v862_v59 }
 0x171   : > { %1048 = vmatpush1.bf16.msra.mxu0 %v2165_v13  ;;  %1091 = vmatpush1.bf16.msra.mxu1 %v2167_v14 }
 0x172   : > { %1049 = vmatprep.subr.bf16.mxu0 %v2170_v15  ;;  %1092 = vmatprep.subr.bf16.mxu1 %v2173_v16 }
 0x173   : > { %1079 = vmatprep.mubr.bf16.mxu0 %v2008_v3  ;;  %1122 = vmatprep.mubr.bf16.mxu1 %v2008_v3 }
 0x175   : > { %1050 = vmatpush1.bf16.msra.mxu0 %v2177_v17  ;;  %1093 = vmatpush1.bf16.msra.mxu1 %v2181_v18 }
 0x176   : > { %1051 = vmatprep.subr.bf16.mxu0 %v2185_v19  ;;  %1094 = vmatprep.subr.bf16.mxu1 %v2190_v21 }
 0x179   : > { %1052 = vmatpush1.bf16.msra.mxu0 %v2192_v22  ;;  %1095 = vmatpush1.bf16.msra.mxu1 %v2196_v23 }
 0x17a   : > { %1053 = vmatprep.subr.bf16.mxu0 %v2200_v24  ;;  %1096 = vmatprep.subr.bf16.mxu1 %v2202_v25 }
 0x17d   : > { %1054 = vmatpush1.bf16.msra.mxu0 %v2206_v26  ;;  %1097 = vmatpush1.bf16.msra.mxu1 %v2210_v27 }
 0x17e   : > { %1055 = vmatprep.subr.bf16.mxu0 %v2214_v28  ;;  %1098 = vmatprep.subr.bf16.mxu1 %v2216_v29 }
 0x181   : > { %1056 = vmatpush1.bf16.msra.mxu0 %v2221_v31  ;;  %1099 = vmatpush1.bf16.msra.mxu1 %v2223_v32 }
 0x182   : > { %1057 = vmatprep.subr.bf16.mxu0 %v2227_v33  ;;  %1100 = vmatprep.subr.bf16.mxu1 %v2231_v34 }
 0x185   : > { %1058 = vmatpush1.bf16.msra.mxu0 %v2235_v35  ;;  %1101 = vmatpush1.bf16.msra.mxu1 %v2237_v36 }
 0x186   : > { %1059 = vmatprep.subr.bf16.mxu0 %v2241_v37  ;;  %1102 = vmatprep.subr.bf16.mxu1 %v2245_v38 }
 0x189   : > { %1060 = vmatpush1.bf16.msra.mxu0 %v2252_v40  ;;  %1103 = vmatpush1.bf16.msra.mxu1 %v2254_v41 }
 0x18a   : > { %1061 = vmatprep.subr.bf16.mxu0 %v2258_v42  ;;  %1104 = vmatprep.subr.bf16.mxu1 %v2260_v43 }
 0x18d   : > { %1062 = vmatpush1.bf16.msra.mxu0 %v2264_v44  ;;  %1105 = vmatpush1.bf16.msra.mxu1 %v2268_v45 }
 0x18e   : > { %1211 = vmatprep.subr.bf16.mxu0 %v2161_v11  ;;  %1254 = vmatprep.subr.bf16.mxu1 %v2163_v12 }
 0x243   : > { %v917_v60 = vpop.f32.mrb[4].mxu0  ;;  %v960_v57 = vpop.f32.mrb[4].mxu1 }
 0x244   : > { %v1600_v61 = vadd.f32 %v917_v60, %v2315_v54  ;;  %v919_v62 = vpop.f32.mrb[5].mxu0  ;;  %v962_v63 = vpop.f32.mrb[5].mxu1  ;;  %v1616_v46 = vadd.f32 %v960_v57, %v2325_v30 }
 0x245   : > { %v1601_v0 = vadd.f32 %v919_v62, %v2317_v55  ;;  %v921_v1 = vpop.f32.mrb[6].mxu0  ;;  %v964_v2 = vpop.f32.mrb[6].mxu1  ;;  %v1617_v39 = vadd.f32 %v962_v63, %v2322_v8 }
 0x246   : > { %v1529_v4 = vmul.f32 -1.442695, %v1600_v61  ;;  %v1602_v5 = vadd.f32 %v921_v1, %v2315_v54  ;;  %v923_v6 = vpop.f32.mrb[7].mxu0  ;;  %v966_v7 = vpop.f32.mrb[7].mxu1  ;;  %v1618_v50 = vadd.f32 %v964_v2, %v2325_v30 }
 0x247   : > { %v1531_v9 = vmul.f32 -1.442695, %v1601_v0  ;;  %v1603_v11 = vadd.f32 %v923_v6, %v2317_v55  ;;  %v1533_v47 = vmul.f32 -1.442695, %v1617_v39  ;;  %v1619_v48 = vadd.f32 %v966_v7, %v2322_v8 }
 0x248   : > { %1812 = vpow2.f32 %v1529_v4  ;;  %v1530_v12 = vmul.f32 -1.442695, %v1602_v5 }
 0x249   : > { %1814 = vpow2.f32 %v1531_v9  ;;  %v1532_v10 = vmul.f32 -1.442695, %v1603_v11  ;;  %v1534_v58 = vmul.f32 -1.442695, %v1619_v48 }
 0x24a   : > { %1816 = vpow2.f32 %v1530_v12 }
 0x24b   : > { %1818 = vpow2.f32 %v1532_v10 }
 0x24c   : > { %1820 = vtanh.f32 %v1616_v46 }
 0x24d   : > { %1822 = vpow2.f32 %v1533_v47 }
 0x24e   : > { %1824 = vtanh.f32 %v1618_v50 }
 0x252   : > { %v1813_v51 = vpop.eup %1812 }
 0x253   : > { %v1815_v53 = vpop.eup %1814  ;;  %v983_v56 = vadd.f32 1.0, %v1813_v51 }
 0x254   : > { %v995_v52 = vadd.f32 1.0, %v1815_v53  ;;  %v1817_v59 = vpop.eup %1816 }
 0x255   : > { %1826 = vrcp.f32 %v983_v56  ;;  %v984_v60 = vadd.f32 1.0, %v1817_v59  ;;  %v1819_v61 = vpop.eup %1818 }
 0x256   : > { %1828 = vrcp.f32 %v995_v52  ;;  %v996_v57 = vadd.f32 1.0, %v1819_v61  ;;  %v1821_v62 = vpop.eup %1820 }
 0x257   : > { %1830 = vpow2.f32 %v1534_v58  ;;  %v1823_v63 = vpop.eup %1822 }
 0x258   : > { %1832 = vrcp.f32 %v984_v60  ;;  %v1825_v0 = vpop.eup %1824  ;;  %v1009_v9 = vadd.f32 1.0, %v1823_v63 }
 0x259   : > { %1834 = vrcp.f32 %v996_v57 }
 0x25a   : > { %1836 = vrcp.f32 %v1009_v9 }
 0x25f   : > { %v1827_v1 = vpop.eup %1826 }
 0x260   : > { %v1829_v2 = vpop.eup %1828  ;;  %v1017_v4 = vmul.f32 %v1827_v1, %v1821_v62 }
 0x261   : > { %v1831_v5 = vpop.eup %1830  ;;  %v1015_v6 = vmul.f32 %v1829_v2, %v2331_v20 }
 0x262   : > { %v1833_v7 = vpop.eup %1832  ;;  %v1010_v39 = vadd.f32 1.0, %v1831_v5 }
 0x263   : > { %v2381_v11 = vadd.f32 %v1017_v4, %v1015_v6  ;;  %v1018_v12 = vmul.f32 %v1833_v7, %v1825_v0  ;;  %v1835_v10 = vpop.eup %1834 }
 0x264   : > { %v1016_v46 = vmul.f32 %v1835_v10, %v2334_v49  ;;  %v1837_v48 = vpop.eup %1836 }
 0x265   : > { %1838 = vtanh.f32 %v2381_v11 }
 0x266   : > { %v2385_v47 = vadd.f32 %v1018_v12, %v1016_v46  ;;  %1840 = vrcp.f32 %v1010_v39 }
 0x268   : > { %1842 = vtanh.f32 %v2385_v47 }
 0x26f   : > { %v1839_v20 = vpop.eup %1838 }
 0x270   : > { %v1841_v50 = vpop.eup %1840  ;;  %v1023_v53 = vmul.f32 %v1839_v20, %v1837_v48 }
 0x272   : > { %v1843_v51 = vpop.eup %1842 }
 0x273   : > { %v1024_v56 = vmul.f32 %v1843_v51, %v1841_v50 }
 0x275   : > { %v1025_v58 = vpack.c.bf16 %v1024_v56, %v1023_v53 }
 0x277   : > { %1593 = vst [vmem:[%s2130_s7 + $0x8] sm:$0xff] %v1025_v58   ;;  %1080 = vmatmul.mubr.bf16.vlgmr.msra.gmra.mrb[8].mxu0 %v1025_v58  ;;  %1123 = vmatmul.mubr.bf16.vlgmr.msra.gmra.mrb[8].mxu1 %v1025_v58 }
 0x278   : > { %1212 = vmatpush1.bf16.msra.mxu0 %v2165_v13  ;;  %1255 = vmatpush1.bf16.msra.mxu1 %v2167_v14 }
 0x279   : > { %1213 = vmatprep.subr.bf16.mxu0 %v2170_v15  ;;  %1256 = vmatprep.subr.bf16.mxu1 %v2173_v16 }
 0x27a   : > { %1243 = vmatprep.mubr.bf16.mxu0 %v2008_v3  ;;  %1286 = vmatprep.mubr.bf16.mxu1 %v2008_v3 }
 0x27c   : > { %1214 = vmatpush1.bf16.msra.mxu0 %v2177_v17  ;;  %1257 = vmatpush1.bf16.msra.mxu1 %v2181_v18 }
 0x27d   : > { %1215 = vmatprep.subr.bf16.mxu0 %v2185_v19  ;;  %1258 = vmatprep.subr.bf16.mxu1 %v2190_v21 }
 0x280   : > { %1216 = vmatpush1.bf16.msra.mxu0 %v2192_v22  ;;  %1259 = vmatpush1.bf16.msra.mxu1 %v2196_v23 }
 0x281   : > { %1217 = vmatprep.subr.bf16.mxu0 %v2200_v24  ;;  %1260 = vmatprep.subr.bf16.mxu1 %v2202_v25 }
 0x284   : > { %1218 = vmatpush1.bf16.msra.mxu0 %v2206_v26  ;;  %1261 = vmatpush1.bf16.msra.mxu1 %v2210_v27 }
 0x285   : > { %1219 = vmatprep.subr.bf16.mxu0 %v2214_v28  ;;  %1262 = vmatprep.subr.bf16.mxu1 %v2216_v29 }
 0x288   : > { %1220 = vmatpush1.bf16.msra.mxu0 %v2221_v31  ;;  %1263 = vmatpush1.bf16.msra.mxu1 %v2223_v32 }
 0x289   : > { %1221 = vmatprep.subr.bf16.mxu0 %v2227_v33  ;;  %1264 = vmatprep.subr.bf16.mxu1 %v2231_v34 }
 0x28c   : > { %1222 = vmatpush1.bf16.msra.mxu0 %v2235_v35  ;;  %1265 = vmatpush1.bf16.msra.mxu1 %v2237_v36 }
 0x28d   : > { %1223 = vmatprep.subr.bf16.mxu0 %v2241_v37  ;;  %1266 = vmatprep.subr.bf16.mxu1 %v2245_v38 }
 0x290   : > { %1224 = vmatpush1.bf16.msra.mxu0 %v2252_v40  ;;  %1267 = vmatpush1.bf16.msra.mxu1 %v2254_v41 }
 0x291   : > { %1225 = vmatprep.subr.bf16.mxu0 %v2258_v42  ;;  %1268 = vmatprep.subr.bf16.mxu1 %v2260_v43 }
 0x294   : > { %1226 = vmatpush1.bf16.msra.mxu0 %v2264_v44  ;;  %1269 = vmatpush1.bf16.msra.mxu1 %v2268_v45 }
 0x34a   : > { %v1081_v3 = vpop.f32.mrb[8].mxu0  ;;  %v1124_v13 = vpop.f32.mrb[8].mxu1 }
 0x34b   : > { %v1604_v14 = vadd.f32 %v1081_v3, %v2315_v54  ;;  %v1083_v15 = vpop.f32.mrb[9].mxu0  ;;  %v1126_v16 = vpop.f32.mrb[9].mxu1  ;;  %v1620_v31 = vadd.f32 %v1124_v13, %v2325_v30 }
 0x34c   : > { %v1605_v17 = vadd.f32 %v1083_v15, %v2317_v55  ;;  %v1085_v18 = vpop.f32.mrb[10].mxu0  ;;  %v1128_v19 = vpop.f32.mrb[10].mxu1  ;;  %v1621_v29 = vadd.f32 %v1126_v16, %v2322_v8 }
 0x34d   : > { %v1539_v21 = vmul.f32 -1.442695, %v1604_v14  ;;  %v1606_v22 = vadd.f32 %v1085_v18, %v2315_v54  ;;  %v1087_v23 = vpop.f32.mrb[11].mxu0  ;;  %v1130_v24 = vpop.f32.mrb[11].mxu1  ;;  %v1622_v34 = vadd.f32 %v1128_v19, %v2325_v30 }
 0x34e   : > { %v1541_v25 = vmul.f32 -1.442695, %v1605_v17  ;;  %v1607_v26 = vadd.f32 %v1087_v23, %v2317_v55  ;;  %v1543_v32 = vmul.f32 -1.442695, %v1621_v29  ;;  %v1623_v33 = vadd.f32 %v1130_v24, %v2322_v8 }
 0x34f   : > { %1844 = vpow2.f32 %v1539_v21  ;;  %v1540_v27 = vmul.f32 -1.442695, %v1606_v22 }
 0x350   : > { %1846 = vpow2.f32 %v1541_v25  ;;  %v1542_v28 = vmul.f32 -1.442695, %v1607_v26  ;;  %v1544_v38 = vmul.f32 -1.442695, %v1623_v33 }
 0x351   : > { %1848 = vpow2.f32 %v1540_v27 }
 0x352   : > { %1850 = vpow2.f32 %v1542_v28 }
 0x353   : > { %1852 = vtanh.f32 %v1620_v31 }
 0x354   : > { %1854 = vpow2.f32 %v1543_v32 }
 0x355   : > { %1856 = vtanh.f32 %v1622_v34 }
 0x359   : > { %v1845_v35 = vpop.eup %1844 }
 0x35a   : > { %v1847_v36 = vpop.eup %1846  ;;  %v1147_v37 = vadd.f32 1.0, %v1845_v35 }
 0x35b   : > { %v1159_v40 = vadd.f32 1.0, %v1847_v36  ;;  %v1849_v41 = vpop.eup %1848 }
 0x35c   : > { %1858 = vrcp.f32 %v1147_v37  ;;  %v1148_v42 = vadd.f32 1.0, %v1849_v41  ;;  %v1851_v43 = vpop.eup %1850 }
 0x35d   : > { %1860 = vrcp.f32 %v1159_v40  ;;  %v1160_v44 = vadd.f32 1.0, %v1851_v43  ;;  %v1853_v45 = vpop.eup %1852 }
 0x35e   : > { %1862 = vpow2.f32 %v1544_v38  ;;  %v1855_v49 = vpop.eup %1854 }
 0x35f   : > { %1864 = vrcp.f32 %v1148_v42  ;;  %v1857_v52 = vpop.eup %1856  ;;  %v1173_v0 = vadd.f32 1.0, %v1855_v49 }
 0x360   : > { %1866 = vrcp.f32 %v1160_v44 }
 0x361   : > { %1868 = vrcp.f32 %v1173_v0 }
 0x366   : > { %v1859_v59 = vpop.eup %1858 }
 0x367   : > { %v1861_v60 = vpop.eup %1860  ;;  %v1181_v61 = vmul.f32 %v1859_v59, %v1853_v45 }
 0x368   : > { %v1863_v57 = vpop.eup %1862  ;;  %v1179_v62 = vmul.f32 %v1861_v60, %v2381_v11 }
 0x369   : > { %v1865_v63 = vpop.eup %1864  ;;  %v1174_v5 = vadd.f32 1.0, %v1863_v57 }
 0x36a   : > { %v2430_v1 = vadd.f32 %v1181_v61, %v1179_v62  ;;  %v1182_v2 = vmul.f32 %v1865_v63, %v1857_v52  ;;  %v1867_v4 = vpop.eup %1866 }
 0x36b   : > { %v1180_v6 = vmul.f32 %v1867_v4, %v2385_v47  ;;  %v1869_v9 = vpop.eup %1868 }
 0x36c   : > { %1870 = vtanh.f32 %v2430_v1 }
 0x36d   : > { %v2434_v7 = vadd.f32 %v1182_v2, %v1180_v6  ;;  %1872 = vrcp.f32 %v1174_v5 }
 0x36f   : > { %1874 = vtanh.f32 %v2434_v7 }
 0x376   : > { %v1871_v11 = vpop.eup %1870 }
 0x377   : > { %v1873_v12 = vpop.eup %1872  ;;  %v1187_v39 = vmul.f32 %v1871_v11, %v1869_v9 }
 0x379   : > { %v1875_v10 = vpop.eup %1874 }
 0x37a   : > { %v1188_v46 = vmul.f32 %v1875_v10, %v1873_v12 }
 0x37c   : > { %v1189_v48 = vpack.c.bf16 %v1188_v46, %v1187_v39 }
 0x37e   : > { %1594 = vst [vmem:[%s2130_s7 + $0x10] sm:$0xff] %v1189_v48   ;;  %1244 = vmatmul.mubr.bf16.vlgmr.msra.gmra.mrb[12].mxu0 %v1189_v48  ;;  %1287 = vmatmul.mubr.bf16.vlgmr.msra.gmra.mrb[12].mxu1 %v1189_v48 }
 0x451   : > { %v1245_v20 = vpop.f32.mrb[12].mxu0  ;;  %v1288_v47 = vpop.f32.mrb[12].mxu1 }
 0x452   : > { %v1608_v50 = vadd.f32 %v1245_v20, %v2315_v54  ;;  %v1247_v51 = vpop.f32.mrb[13].mxu0  ;;  %v1290_v53 = vpop.f32.mrb[13].mxu1  ;;  %v1624_v23 = vadd.f32 %v1288_v47, %v2325_v30 }
 0x453   : > { %v1609_v56 = vadd.f32 %v1247_v51, %v2317_v55  ;;  %v1249_v58 = vpop.f32.mrb[14].mxu0  ;;  %v1292_v3 = vpop.f32.mrb[14].mxu1  ;;  %v1625_v22 = vadd.f32 %v1290_v53, %v2322_v8 }
 0x454   : > { %v1549_v13 = vmul.f32 -1.442695, %v1608_v50  ;;  %v1610_v14 = vadd.f32 %v1249_v58, %v2315_v54  ;;  %v1251_v15 = vpop.f32.mrb[15].mxu0  ;;  %v1294_v16 = vpop.f32.mrb[15].mxu1  ;;  %v1626_v54 = vadd.f32 %v1292_v3, %v2325_v30 }
 0x455   : > { %v1551_v17 = vmul.f32 -1.442695, %v1609_v56  ;;  %v1611_v18 = vadd.f32 %v1251_v15, %v2317_v55  ;;  %v1553_v24 = vmul.f32 -1.442695, %v1625_v22  ;;  %v1627_v25 = vadd.f32 %v1294_v16, %v2322_v8 }
 0x456   : > { %1876 = vpow2.f32 %v1549_v13  ;;  %v1550_v19 = vmul.f32 -1.442695, %v1610_v14 }
 0x457   : > { %1878 = vpow2.f32 %v1551_v17  ;;  %v1552_v21 = vmul.f32 -1.442695, %v1611_v18  ;;  %v1554_v55 = vmul.f32 -1.442695, %v1627_v25 }
 0x458   : > { %1880 = vpow2.f32 %v1550_v19 }
 0x459   : > { %1882 = vpow2.f32 %v1552_v21 }
 0x45a   : > { %1884 = vtanh.f32 %v1624_v23 }
 0x45b   : > { %1886 = vpow2.f32 %v1553_v24 }
 0x45c   : > { %1888 = vtanh.f32 %v1626_v54 }
 0x460   : > { %v1877_v26 = vpop.eup %1876 }
 0x461   : > { %v1879_v27 = vpop.eup %1878  ;;  %v1311_v28 = vadd.f32 1.0, %v1877_v26 }
 0x462   : > { %v1323_v29 = vadd.f32 1.0, %v1879_v27  ;;  %v1881_v31 = vpop.eup %1880 }
 0x463   : > { %1890 = vrcp.f32 %v1311_v28  ;;  %v1312_v32 = vadd.f32 1.0, %v1881_v31  ;;  %v1883_v33 = vpop.eup %1882 }
 0x464   : > { %1892 = vrcp.f32 %v1323_v29  ;;  %v1324_v34 = vadd.f32 1.0, %v1883_v33  ;;  %v1885_v8 = vpop.eup %1884 }
 0x465   : > { %1894 = vpow2.f32 %v1554_v55  ;;  %v1887_v35 = vpop.eup %1886 }
 0x466   : > { %1896 = vrcp.f32 %v1312_v32  ;;  %v1889_v30 = vpop.eup %1888  ;;  %v1337_v40 = vadd.f32 1.0, %v1887_v35 }
 0x467   : > { %1898 = vrcp.f32 %v1324_v34 }
 0x468   : > { %1900 = vrcp.f32 %v1337_v40 }
 0x46d   : > { %v1891_v36 = vpop.eup %1890 }
 0x46e   : > { %v1893_v37 = vpop.eup %1892  ;;  %v1345_v38 = vmul.f32 %v1891_v36, %v1885_v8 }
 0x46f   : > { %v1895_v41 = vpop.eup %1894  ;;  %v1343_v42 = vmul.f32 %v1893_v37, %v2430_v1 }
 0x470   : > { %v1897_v43 = vpop.eup %1896  ;;  %v1338_v52 = vadd.f32 1.0, %v1895_v41 }
 0x471   : > { %v1347_v44 = vadd.f32 %v1345_v38, %v1343_v42  ;;  %v1346_v45 = vmul.f32 %v1897_v43, %v1889_v30  ;;  %v1899_v49 = vpop.eup %1898 }
 0x472   : > { %v1344_v59 = vmul.f32 %v1899_v49, %v2434_v7  ;;  %v1901_v61 = vpop.eup %1900 }
 0x473   : > { %1902 = vtanh.f32 %v1347_v44  ;;  %1366 = vst [vmem:[#allocation4] sm:$0xff] %v1347_v44 }
 0x474   : > { %v1348_v60 = vadd.f32 %v1346_v45, %v1344_v59  ;;  %1904 = vrcp.f32 %v1338_v52 }
 0x476   : > { %1906 = vtanh.f32 %v1348_v60  ;;  %1367 = vst [vmem:[#allocation4 + $0x8] sm:$0xff] %v1348_v60 }
 0x47d   : > { %v1903_v57 = vpop.eup %1902 }
 0x47e   : > { %v1351_v62 = vmul.f32 %v1903_v57, %v1901_v61  ;;  %v1905_v63 = vpop.eup %1904 }
 0x480   : > { %1364 = vst [vmem:[#allocation3] sm:$0xff] %v1351_v62  ;;  %v1907_v0 = vpop.eup %1906 }
 0x481   : > { %v1352_v1 = vmul.f32 %v1907_v0, %v1905_v63 }
 0x483   : > { %v1591_v2 = vpack.c.bf16 %v1352_v1, %v1351_v62  ;;  %1365 = vst [vmem:[#allocation3 + $0x8] sm:$0xff] %v1352_v1 }
 0x485   : > { %1595 = vst [vmem:[%s2130_s7 + $0x18] sm:$0xff] %v1591_v2  }
 0x486   : > { %1949 = shalt.err (!%p1946_p8)
}
 0x487   : > { %s1950_s23 = scalar_lea.hbm %s2453_s20, 512  ;;  %s1954_s6 = scalar_lea.hbm %s2505_s4, 1024 }
 0x488   : > { %p1951_p12 = scmp.ne.s32.totalorder %s2453_s20, %s1950_s23  ;;  %p1955_p1 = scmp.lt.u32.totalorder %s2453_s20, %s2505_s4 }
 0x489   : > { %p1956_p5 = scmp.lt.u32.totalorder %s1954_s6, %s1950_s23  ;;  %p1958_p9 = scmp.lt.u32.totalorder %s1950_s23, %s2453_s20 }
 0x48a   : > { %p1952_p0 = pnand %p1951_p12, %p2517_p10 }
 0x48b   : > { %p1957_p6 = por %p1956_p5, %p1955_p1 }
 0x48c   : > { %p1953_p2 = pneg %p1952_p0 }
 0x48d   : > { %p1959_p11 = por %p1958_p9, %p1957_p6 }
 0x48f   : > { %p1960_p13 = pnand %p1959_p11, %p1953_p2 }
 0x491   : > { %1963 = shalt.err (!%p1960_p13)
}
 0x492   : > { %s2010_s27 = smov 64   ;;  %s2011_s10 = smov 4  }
 0x493   : > { %1664 = dma.vmem_to_hbm [thread:$0]  (%p2517_p10), %s2455_s12, 512, %s2453_s20, %s2460_s22, %s2010_s27, %s2010_s27, %s2011_s10  }
 0x494 PF: > { %p1676_p3 = scmp.ge.s32.totalorder %s2002_s18, 2  ;;  %s1397_s11 = sand.u32 1, %s1990_s15  }
 0x495   : > { %p2518_p4 = scmp.ne.s32.totalorder %s2510_s26, 0  ;;  %s1398_s13 = scalar_lea.sflag [#allocation7], %s1397_s11 }
 0x497   : > { %p1671_p7 = pnand %p1676_p3, %p2518_p4 }
 0x499   : > { %1985 = dma.done.wait (!%p1671_p7), %s1398_s13, 512  }
 0x49a   : > { %1987 = vsyncadd (!%p1671_p7), %s1398_s13, 4294966784  ;;  %p15_p8 = scmp.ge.s32.totalorder %s2062_s21, 4   ;;  %s2519_s15 = smov %s1994_s16 }
 0x49b   : > { %s2520_s16 = smov %s1998_s17  ;;  %s2521_s17 = smov %s2073_s24 }
 0x49c   : > { %s2522_s18 = smov %s2062_s21  ;;  %17 = sbr.rel (!%p15_p8) target bundleno = 4 (0x4), region = 87 }
 0x4a3   :  { %1403 = vsyncpa [#allocation6], 1 }
 0x4a4   :  { %1405 = vsyncpa [#allocation6 + $0x1], 1 }
 0x4a5   :  { %1406 = vsyncpa [#allocation7], 1 }
 0x4a6   :  { %1408 = vsyncpa [#allocation7 + $0x1], 1 }

</bundles_post_ra>
